<compile_context>
chip_gen: v7x
topology: tpu7x:2x2x1
jax: 0.10.0
libtpu: 0.0.40
codegen_flags: <defaults>
</compile_context>

<pallas_src>
import jax
import jax.numpy as jnp
from jax import lax
from jax.experimental import pallas as pl
from jax.experimental.pallas import tpu as pltpu


def _round_up(x, m):
    return (x + m - 1) // m * m


def t_attention_kernel(x_ref, w1_ref, b1_ref, w2_ref, b2_ref, o_ref):
    # x_ref:  (tm, in_dim)   rows of flattened embeddings (native dtype)
    # w1_ref: (in_dim, hid)  first Linear weight
    # b1_ref: (1, hid)       first Linear bias
    # w2_ref: (1, hid)       second Linear weight, stored as a row
    # b2_ref: (1, 1)         second Linear bias
    # o_ref:  (1, tm)        lane-dense attention scores for this tile
    h = jnp.dot(x_ref[...], w1_ref[...], preferred_element_type=jnp.float32)
    h = jnp.tanh(h + b1_ref[...].astype(jnp.float32))
    # (1, hid) . (tm, hid)^T -> (1, tm): score row comes out lane-dense.
    e = lax.dot_general(
        w2_ref[...].astype(jnp.float32), h,
        dimension_numbers=(((1,), (1,)), ((), ())),
        preferred_element_type=jnp.float32)
    o_ref[...] = (e + b2_ref[...].astype(jnp.float32)).astype(o_ref.dtype)


def t_attention(embeddings, w1, b1, w2, b2, *, tm=2048):
    """embeddings: (B, T, in_dim) -> (B, T, 1); matches
    nn.Sequential(Linear(in_dim, hid), Tanh(), Linear(hid, 1))."""
    B, T, in_dim = embeddings.shape
    hid = w1.shape[1]
    N = B * T

    # Tile rows: multiple of 128 (lane-dense output row), capped by problem size.
    tm_eff = _round_up(min(tm, _round_up(N, 128)), 128)
    N_pad = _round_up(N, tm_eff)
    num_tiles = N_pad // tm_eff

    x2d = embeddings.reshape(N, in_dim)
    if N_pad != N:
        x2d = jnp.pad(x2d, ((0, N_pad - N), (0, 0)))

    b1_2d = b1.reshape(1, hid)
    w2_row = w2.reshape(1, hid)   # (hid, 1) -> (1, hid)
    b2_2d = b2.reshape(1, 1)

    out = pl.pallas_call(
        t_attention_kernel,
        out_shape=jax.ShapeDtypeStruct((num_tiles, tm_eff), embeddings.dtype),
        grid_spec=pltpu.PrefetchScalarGridSpec(
            num_scalar_prefetch=0,
            grid=(num_tiles,),
            in_specs=[
                pl.BlockSpec((tm_eff, in_dim), lambda i: (i, 0)),  # x rows
                pl.BlockSpec((in_dim, hid), lambda i: (0, 0)),     # W1 (whole)
                pl.BlockSpec((1, hid), lambda i: (0, 0)),          # b1
                pl.BlockSpec((1, hid), lambda i: (0, 0)),          # W2 row
                pl.BlockSpec((1, 1), lambda i: (0, 0)),            # b2
            ],
            out_specs=pl.BlockSpec((1, tm_eff), lambda i: (i, 0)),
        ),
        compiler_params=pltpu.CompilerParams(
            dimension_semantics=("parallel",)),
        # TODO(synk): optionally pin w1/b1/w2/b2 with pipeline_mode=pl.Buffered(1)
        # to drop their second VMEM buffer; negligible at these weight sizes.
    )(x2d, w1, b1_2d, w2_row, b2_2d)

    return out.reshape(N_pad)[:N].reshape(B, T, 1)


def init_params(key, in_dim, hid_dim, dtype=jnp.float32):
    # Deterministic init mimicking nn.Linear default: U(-1/sqrt(fan_in), 1/sqrt(fan_in))
    k1, k2, k3, k4 = jax.random.split(key, 4)
    lim1 = 1.0 / jnp.sqrt(jnp.array(in_dim, jnp.float32))
    lim2 = 1.0 / jnp.sqrt(jnp.array(hid_dim, jnp.float32))
    w1 = jax.random.uniform(k1, (in_dim, hid_dim), dtype, -lim1, lim1)
    b1 = jax.random.uniform(k2, (hid_dim,), dtype, -lim1, lim1)
    w2 = jax.random.uniform(k3, (hid_dim, 1), dtype, -lim2, lim2)
    b2 = jax.random.uniform(k4, (1,), dtype, -lim2, lim2)
    return w1, b1, w2, b2


if __name__ == "__main__":
    key = jax.random.PRNGKey(0)
    B, T, in_dim, hid_dim = 2, 8, 32, 32

    kx, kp = jax.random.split(key)
    embeddings = jax.random.normal(kx, (B, T, in_dim), jnp.float32)
    w1, b1, w2, b2 = init_params(kp, in_dim, hid_dim)

    out = t_attention(embeddings, w1, b1, w2, b2)
    out = jax.block_until_ready(out)
    ref = jnp.tanh(embeddings @ w1 + b1) @ w2 + b2
    assert out.shape == (B, T, 1)
    assert jnp.allclose(out, ref, atol=2e-5, rtol=2e-5)

    # Exercise the multi-tile + padding path (N not a multiple of the tile).
    B2, T2 = 3, 1000   # N = 3000 -> padded to 2 tiles of 2048 rows
    emb2 = jax.random.normal(jax.random.fold_in(kx, 1), (B2, T2, in_dim), jnp.float32)
    out2 = jax.block_until_ready(t_attention(emb2, w1, b1, w2, b2))
    ref2 = jnp.tanh(emb2 @ w1 + b1) @ w2 + b2
    assert out2.shape == (B2, T2, 1)
    assert jnp.allclose(out2, ref2, atol=2e-5, rtol=2e-5)

    print("KERNEL_OK")
</pallas_src>

<mosaic_0001>
module attributes {stable_mosaic.version = 11 : i64} {
  func.func @t_attention_kernel(%arg0: i32, %arg1: memref<128x32xf32, #tpu.memory_space<vmem>>, %arg2: memref<32x32xf32, #tpu.memory_space<vmem>>, %arg3: memref<1x32xf32, #tpu.memory_space<vmem>>, %arg4: memref<1x32xf32, #tpu.memory_space<vmem>>, %arg5: memref<1x1xf32, #tpu.memory_space<vmem>>, %arg6: memref<1x128xf32, #tpu.memory_space<vmem>>) attributes {dimension_semantics = [#tpu.dimension_semantics<parallel>], iteration_bounds = array<i64: 1>, scalar_prefetch = 0 : i64, scratch_operands = 0 : i64, tpu.core_type = #tpu.core_type<tc>, window_params = [{transform_indices = @transform_0, window_bounds = array<i64: 128, 32>}, {pipeline_mode = #tpu.pipeline_mode<synchronous>, transform_indices = @transform_1, window_bounds = array<i64: 32, 32>}, {pipeline_mode = #tpu.pipeline_mode<synchronous>, transform_indices = @transform_2, window_bounds = array<i64: 1, 32>}, {pipeline_mode = #tpu.pipeline_mode<synchronous>, transform_indices = @transform_3, window_bounds = array<i64: 1, 32>}, {pipeline_mode = #tpu.pipeline_mode<synchronous>, transform_indices = @transform_4, window_bounds = array<i64: 1, 1>}, {transform_indices = @transform_5, window_bounds = array<i64: 1, 128>}]} {
    %c0 = arith.constant 0 : index
    %c0_0 = arith.constant 0 : index
    %0 = vector.load %arg1[%c0, %c0_0] : memref<128x32xf32, #tpu.memory_space<vmem>>, vector<128x32xf32>
    %c0_1 = arith.constant 0 : index
    %c0_2 = arith.constant 0 : index
    %1 = vector.load %arg2[%c0_1, %c0_2] : memref<32x32xf32, #tpu.memory_space<vmem>>, vector<32x32xf32>
    %cst = arith.constant dense<0.000000e+00> : vector<128x32xf32>
    %2 = tpu.matmul %0, %1, %cst {dimension_numbers = #tpu.dot_dimension_numbers<[1], [0], [0], [1], [0, 0, 1, 1], [], []>} : vector<128x32xf32>, vector<32x32xf32>, vector<128x32xf32> -> vector<128x32xf32>
    %c0_3 = arith.constant 0 : index
    %c0_4 = arith.constant 0 : index
    %3 = vector.load %arg3[%c0_3, %c0_4] : memref<1x32xf32, #tpu.memory_space<vmem>>, vector<1x32xf32>
    %4 = vector.broadcast %3 : vector<1x32xf32> to vector<128x32xf32>
    %5 = arith.addf %2, %4 : vector<128x32xf32>
    %6 = math.tanh %5 : vector<128x32xf32>
    %c0_5 = arith.constant 0 : index
    %c0_6 = arith.constant 0 : index
    %7 = vector.load %arg4[%c0_5, %c0_6] : memref<1x32xf32, #tpu.memory_space<vmem>>, vector<1x32xf32>
    %cst_7 = arith.constant dense<0.000000e+00> : vector<1x128xf32>
    %8 = tpu.matmul %7, %6, %cst_7 {dimension_numbers = #tpu.dot_dimension_numbers<[1], [1], [0], [0], [0, 0, 1, 0], [], []>} : vector<1x32xf32>, vector<128x32xf32>, vector<1x128xf32> -> vector<1x128xf32>
    %c0_8 = arith.constant 0 : index
    %c0_9 = arith.constant 0 : index
    %9 = vector.load %arg5[%c0_8, %c0_9] : memref<1x1xf32, #tpu.memory_space<vmem>>, vector<1x1xf32>
    %10 = vector.broadcast %9 : vector<1x1xf32> to vector<1x128xf32>
    %11 = arith.addf %8, %10 : vector<1x128xf32>
    %c0_10 = arith.constant 0 : index
    %c0_11 = arith.constant 0 : index
    %12 = vector.load %arg6[%c0_10, %c0_11] : memref<1x128xf32, #tpu.memory_space<vmem>>, vector<1x128xf32>
    tpu.vector_store %arg6[%c0_10, %c0_11], %11 {strides = array<i32>} : memref<1x128xf32, #tpu.memory_space<vmem>>, vector<1x128xf32>,
    return
  }
  func.func @transform_0(%arg0: i32) -> (i32, i32) {
    %c0_i32 = arith.constant 0 : i32
    %c0_i32_0 = arith.constant 0 : i32
    return %arg0, %c0_i32 : i32, i32
  }
  func.func @transform_1(%arg0: i32) -> (i32, i32) {
    %c0_i32 = arith.constant 0 : i32
    %c0_i32_0 = arith.constant 0 : i32
    %c0_i32_1 = arith.constant 0 : i32
    return %c0_i32, %c0_i32_0 : i32, i32
  }
  func.func @transform_2(%arg0: i32) -> (i32, i32) {
    %c0_i32 = arith.constant 0 : i32
    %c0_i32_0 = arith.constant 0 : i32
    %c0_i32_1 = arith.constant 0 : i32
    return %c0_i32, %c0_i32_0 : i32, i32
  }
  func.func @transform_3(%arg0: i32) -> (i32, i32) {
    %c0_i32 = arith.constant 0 : i32
    %c0_i32_0 = arith.constant 0 : i32
    %c0_i32_1 = arith.constant 0 : i32
    return %c0_i32, %c0_i32_0 : i32, i32
  }
  func.func @transform_4(%arg0: i32) -> (i32, i32) {
    %c0_i32 = arith.constant 0 : i32
    %c0_i32_0 = arith.constant 0 : i32
    %c0_i32_1 = arith.constant 0 : i32
    return %c0_i32, %c0_i32_0 : i32, i32
  }
  func.func @transform_5(%arg0: i32) -> (i32, i32) {
    %c0_i32 = arith.constant 0 : i32
    %c0_i32_0 = arith.constant 0 : i32
    return %arg0, %c0_i32 : i32, i32
  }
}

</mosaic_0001>

<bundles_post_ra>
// kernel: tpu_custom_call.1
= control target key start
LH: loop header
LB: loop body
LE: loop exit
PB: predicated region body
PF: predicated region fallthrough
CT: control target
= control target key end

     0   :  { %s828_s0 = inlined_call_operand.vmem [shape: f32[128,32], index: 0, kind: input, shape index: {}]   ;;  %s829_s1 = inlined_call_operand.vmem [shape: f32[32,32], index: 1, kind: input, shape index: {}]   ;;  %s830_s2 = inlined_call_operand.vmem [shape: f32[1,32], index: 2, kind: input, shape index: {}]   ;;  %s831_s3 = inlined_call_operand.vmem [shape: f32[1,32], index: 3, kind: input, shape index: {}]   ;;  %s832_s4 = inlined_call_operand.<no memory space> [shape: f32[1,1], index: 4, kind: input, shape index: {}]   ;;  %s833_s5 = inlined_call_operand.hbm [shape: f32[1,128], index: 5, kind: output, shape index: {}]  }
   0x1   :  { %v10_v0 = vstv %s832_s4 }
   0x2   :  { %11 = vst [vmem:[#allocation2] sm:$0x1] %v10_v0 }
   0x3   :  { %v39_v1 = vld [vmem:[%s829_s1] sm:$0xff]  ;;  %v40_v2 = vld [vmem:[%s829_s1 + $0x8] sm:$0xff]  ;;  %v41_v3 = vld [vmem:[%s829_s1 + $0x10] sm:$0xff]  ;;  %vm50_vm0 = vcmask 261120  }
   0x4   :  { %v545_v4 = vpack.c.bf16 %v40_v2, %v39_v1  ;;  %v42_v5 = vld [vmem:[%s829_s1 + $0x18] sm:$0xff]  ;;  %v23_v6 = vld [vmem:[%s828_s0] sm:$0xff] }
   0x5   :  { %v549_v7 = vpack.c.bf16 %v42_v5, %v41_v3  ;;  %486 = vmatprep.mubr.msk.f32.mxu0 %vm50_vm0, %v23_v6 }
   0x6   :  { %546 = vmatprep.subr.bf16.mxu0 %v545_v4 }
   0x7   :  { %548 = vmatpush3.bf16.msra.mxu0 %v545_v4 }
   0x8   :  { %550 = vmatprep.subr.bf16.mxu0 %v549_v7 }
   0x9   :  { %12 = vsyncpa [#allocation4], 0  ;;  %v24_v8 = vld [vmem:[%s828_s0 + $0x8] sm:$0xff]  ;;  %v25_v9 = vld [vmem:[%s828_s0 + $0x10] sm:$0xff]  ;;  %v647_v23 = vmov 0.0|0.0   ;;  %vm648_vm1 = vmmov 0  }
   0xa   :  { %v26_v10 = vld [vmem:[%s828_s0 + $0x18] sm:$0xff]  ;;  %v27_v11 = vld [vmem:[%s828_s0 + $0x20] sm:$0xff]  ;;  %v28_v12 = vld [vmem:[%s828_s0 + $0x28] sm:$0xff]  ;;  %553 = vmatprep.subr.bf16.mxu1 %v647_v23  ;;  %v649_v24 = vmov 0.0   ;;  %v650_v26 = vmov 0   ;;  %s651_s8 = smov [#allocation3]  }
   0xb   :  { %552 = vmatpush3.bf16.msra.mxu0 %v549_v7  ;;  %v29_v13 = vld [vmem:[%s828_s0 + $0x30] sm:$0xff]  ;;  %v30_v14 = vld [vmem:[%s828_s0 + $0x38] sm:$0xff]  ;;  %v31_v15 = vld [vmem:[%s828_s0 + $0x40] sm:$0xff]  ;;  %542 = vmatprep.mubr.msk.f32.mxu1 %vm648_vm1, %v649_v24  ;;  %s399_s9 = sshll.u32 %s651_s8, 4  ;;  %s400_s9 = int_to_ptr.vmem [resolvable:$true] %s399_s9 }
   0xc   :  { %v32_v16 = vld [vmem:[%s828_s0 + $0x48] sm:$0xff]  ;;  %v33_v17 = vld [vmem:[%s828_s0 + $0x50] sm:$0xff]  ;;  %v34_v18 = vld [vmem:[%s828_s0 + $0x58] sm:$0xff]  ;;  %590 = vset.pattern.permute.xlu0 %v650_v26  ;;  %s623_s10 = scalar_lea.vmem %s400_s9, 16  ;;  %s627_s11 = scalar_lea.vmem %s400_s9, 32 }
   0xd   :  { %v35_v19 = vld [vmem:[%s828_s0 + $0x60] sm:$0xff]  ;;  %v36_v20 = vld [vmem:[%s828_s0 + $0x68] sm:$0xff]  ;;  %v37_v21 = vld [vmem:[%s828_s0 + $0x70] sm:$0xff]  ;;  %p624_p0 = scmp.ne.s32.totalorder %s400_s9, %s623_s10  ;;  %p628_p1 = scmp.lt.s32.totalorder %s400_s9, %s400_s9 }
   0xe   :  { %487 = vmatmul.mubr.msk.f32.vlgmr.msra.gmra.mrb[0].mxu0 %vm50_vm0, %v24_v8  ;;  %v38_v22 = vld [vmem:[%s828_s0 + $0x78] sm:$0xff]  ;;  %v261_v25 = vld [vmem:[#allocation2] sm:$0x1]  ;;  %vm776_vm2 = vmpackc.low %vm50_vm0, %vm50_vm0  ;;  %p629_p2 = scmp.lt.s32.totalorder %s627_s11, %s623_s10 }
   0xf   :  { %489 = vmatprep.mubr.msk.f32.mxu0 %vm50_vm0, %v25_v9  ;;  %264 = vperm.xlu0 %590, %v261_v25   ;;  %v765_v27 = vld [vmem:[%s830_s2] ss:$0 sm:$0xff] }
  0x10   :  { %p630_p3 = por %p629_p2, %p628_p1 }
  0x12   :  { %490 = vmatmul.mubr.msk.f32.gmra.mrb[2].mxu0 %vm50_vm0, %v26_v10  ;;  %p631_p4 = pnand %p630_p3, %p624_p0 }
  0x13   :  { %492 = vmatprep.mubr.msk.f32.mxu0 %vm50_vm0, %v27_v11 }
  0x16   :  { %493 = vmatmul.mubr.msk.f32.gmra.mrb[4].mxu0 %vm50_vm0, %v28_v12 }
  0x17   :  { %495 = vmatprep.mubr.msk.f32.mxu0 %vm50_vm0, %v29_v13 }
  0x1a   :  { %496 = vmatmul.mubr.msk.f32.gmra.mrb[6].mxu0 %vm50_vm0, %v30_v14 }
  0x1b   :  { %498 = vmatprep.mubr.msk.f32.mxu0 %vm50_vm0, %v31_v15 }
  0x1e   :  { %499 = vmatmul.mubr.msk.f32.gmra.mrb[8].mxu0 %vm50_vm0, %v32_v16 }
  0x1f   :  { %501 = vmatprep.mubr.msk.f32.mxu0 %vm50_vm0, %v33_v17 }
  0x22   :  { %502 = vmatmul.mubr.msk.f32.gmra.mrb[10].mxu0 %vm50_vm0, %v34_v18 }
  0x23   :  { %504 = vmatprep.mubr.msk.f32.mxu0 %vm50_vm0, %v35_v19 }
  0x26   :  { %505 = vmatmul.mubr.msk.f32.gmra.mrb[12].mxu0 %vm50_vm0, %v36_v20 }
  0x27   :  { %507 = vmatprep.mubr.msk.f32.mxu0 %vm50_vm0, %v37_v21  ;;  %v260_v21 = vld [vmem:[%s831_s3] sm:$0x1] }
  0x2a   :  { %508 = vmatmul.mubr.msk.f32.gmra.mrb[14].mxu0 %vm50_vm0, %v38_v22  ;;  %v267_v22 = vlaneseq }
  0x2c   :  { %v268_v24 = vshrl.u32 %v267_v22, 7 }
  0x2e   :  { %v269_v25 = vsub.s32 0, %v268_v24 }
  0x8e   :  { %v265_v26 = vpop.permute.xlu0 %264 }
  0xe1   :  { %v488_v28 = vpop.f32.mrb[0].mxu0 }
  0xe2   :  { %v171_v29 = vadd.f32 %v488_v28, %v765_v27  ;;  %v165_v30 = vpop.f32.mrb[1].mxu0 }
  0xe3   :  { %v166_v31 = vadd.f32 %v765_v27, %v165_v30 }
  0xe4   :  { %591 = vtanh.f32 %v171_v29 }
  0xe5   :  { %593 = vtanh.f32 %v166_v31  ;;  %v491_v32 = vpop.f32.mrb[2].mxu0 }
  0xe6   :  { %v181_v33 = vadd.f32 %v491_v32, %v765_v27  ;;  %v175_v34 = vpop.f32.mrb[3].mxu0 }
  0xe7   :  { %v176_v35 = vadd.f32 %v765_v27, %v175_v34 }
  0xe8   :  { %595 = vtanh.f32 %v181_v33 }
  0xe9   :  { %597 = vtanh.f32 %v176_v35  ;;  %v494_v36 = vpop.f32.mrb[4].mxu0 }
  0xea   :  { %v191_v37 = vadd.f32 %v494_v36, %v765_v27  ;;  %v185_v38 = vpop.f32.mrb[5].mxu0 }
  0xeb   :  { %v186_v39 = vadd.f32 %v765_v27, %v185_v38 }
  0xec   :  { %599 = vtanh.f32 %v191_v37 }
  0xed   :  { %601 = vtanh.f32 %v186_v39  ;;  %v497_v40 = vpop.f32.mrb[6].mxu0 }
  0xee   :  { %v592_v41 = vpop.eup %591  ;;  %v201_v42 = vadd.f32 %v497_v40, %v765_v27  ;;  %v195_v43 = vpop.f32.mrb[7].mxu0 }
  0xef   :  { %v594_v44 = vpop.eup %593  ;;  %v196_v46 = vadd.f32 %v765_v27, %v195_v43 }
  0xf0   :  { %v554_v47 = vpack.c.bf16 %v592_v41, %v594_v44  ;;  %603 = vtanh.f32 %v201_v42 }
  0xf1   :  { %605 = vtanh.f32 %v196_v46  ;;  %v500_v48 = vpop.f32.mrb[8].mxu0 }
  0xf2   :  { %v596_v49 = vpop.eup %595  ;;  %556 = vmatpush3.bf16.xpose.msk.msra.mxu1 %vm776_vm2, %v554_v47  ;;  %v211_v50 = vadd.f32 %v500_v48, %v765_v27  ;;  %v205_v51 = vpop.f32.mrb[9].mxu0 }
  0xf3   :  { %v598_v52 = vpop.eup %597  ;;  %557 = vmatprep.subr.bf16.mxu1 %v647_v23  ;;  %v206_v53 = vadd.f32 %v765_v27, %v205_v51 }
  0xf4   :  { %v558_v54 = vpack.c.bf16 %v596_v49, %v598_v52  ;;  %607 = vtanh.f32 %v211_v50 }
  0xf5   :  { %609 = vtanh.f32 %v206_v53  ;;  %v503_v55 = vpop.f32.mrb[10].mxu0 }
  0xf6   :  { %v600_v56 = vpop.eup %599  ;;  %v221_v57 = vadd.f32 %v503_v55, %v765_v27  ;;  %v215_v58 = vpop.f32.mrb[11].mxu0 }
  0xf7   :  { %v602_v59 = vpop.eup %601  ;;  %v216_v60 = vadd.f32 %v765_v27, %v215_v58 }
  0xf8   :  { %v562_v61 = vpack.c.bf16 %v600_v56, %v602_v59  ;;  %611 = vtanh.f32 %v221_v57 }
  0xf9   :  { %613 = vtanh.f32 %v216_v60  ;;  %v506_v62 = vpop.f32.mrb[12].mxu0 }
  0xfa   :  { %v604_v63 = vpop.eup %603  ;;  %560 = vmatpush3.bf16.xpose.msk.msra.mxu1 %vm776_vm2, %v558_v54  ;;  %v231_v0 = vadd.f32 %v506_v62, %v765_v27  ;;  %v225_v1 = vpop.f32.mrb[13].mxu0 }
  0xfb   :  { %v606_v2 = vpop.eup %605  ;;  %561 = vmatprep.subr.bf16.mxu1 %v647_v23  ;;  %v226_v3 = vadd.f32 %v765_v27, %v225_v1 }
  0xfc   :  { %v566_v4 = vpack.c.bf16 %v604_v63, %v606_v2  ;;  %615 = vtanh.f32 %v231_v0 }
  0xfd   :  { %617 = vtanh.f32 %v226_v3  ;;  %v509_v5 = vpop.f32.mrb[14].mxu0 }
  0xfe   :  { %v608_v6 = vpop.eup %607  ;;  %v241_v7 = vadd.f32 %v509_v5, %v765_v27  ;;  %v235_v8 = vpop.f32.mrb[15].mxu0 }
  0xff   :  { %v610_v9 = vpop.eup %609  ;;  %v236_v10 = vadd.f32 %v765_v27, %v235_v8  ;;  %v270_v27 = vrot.slane %v265_v26, %v269_v25 }
 0x100   :  { %v570_v11 = vpack.c.bf16 %v608_v6, %v610_v9  ;;  %619 = vtanh.f32 %v241_v7 }
 0x101   :  { %621 = vtanh.f32 %v236_v10 }
 0x102   :  { %v612_v12 = vpop.eup %611  ;;  %564 = vmatpush3.bf16.xpose.msk.msra.mxu1 %vm776_vm2, %v562_v61 }
 0x103   :  { %v614_v13 = vpop.eup %613  ;;  %565 = vmatprep.subr.bf16.mxu1 %v647_v23 }
 0x104   :  { %v574_v14 = vpack.c.bf16 %v612_v12, %v614_v13 }
 0x106   :  { %v616_v15 = vpop.eup %615 }
 0x107   :  { %v618_v16 = vpop.eup %617 }
 0x108   :  { %v578_v17 = vpack.c.bf16 %v616_v15, %v618_v16 }
 0x10a   :  { %v620_v18 = vpop.eup %619  ;;  %568 = vmatpush3.bf16.xpose.msk.msra.mxu1 %vm776_vm2, %v566_v4 }
 0x10b   :  { %v622_v19 = vpop.eup %621  ;;  %569 = vmatprep.subr.bf16.mxu1 %v647_v23 }
 0x10c   :  { %v582_v20 = vpack.c.bf16 %v620_v18, %v622_v19 }
 0x112   :  { %572 = vmatpush3.bf16.xpose.msk.msra.mxu1 %vm776_vm2, %v570_v11 }
 0x113   :  { %573 = vmatprep.subr.bf16.mxu1 %v647_v23 }
 0x11a   :  { %576 = vmatpush3.bf16.xpose.msk.msra.mxu1 %vm776_vm2, %v574_v14 }
 0x11b   :  { %577 = vmatprep.subr.bf16.mxu1 %v647_v23 }
 0x122   :  { %580 = vmatpush3.bf16.xpose.msk.msra.mxu1 %vm776_vm2, %v578_v17 }
 0x123   :  { %581 = vmatprep.subr.bf16.mxu1 %v647_v23 }
 0x12a   :  { %584 = vmatpush3.bf16.xpose.msk.msra.mxu1 %vm776_vm2, %v582_v20 }
 0x131   :  { %543 = vmatmul.mubr.msk.f32.vlgmr.msra.gmra.mrb[0].mxu1 %vm50_vm0, %v260_v21 }
 0x204   :  { %v388_v28 = vpop.f32.mrb[0].mxu1 }
 0x205   :  { %v389_v29 = vadd.f32 %v388_v28, %v270_v27  ;;  %v544_v30 = vpop.f32.mrb[1].mxu1 }
 0x207   :  { %392 = vst [vmem:[#allocation3] sm:$0x1] %v389_v29 }
 0x208   :  { %634 = shalt.err (!%p631_p4)
}
 0x209   :  { %s635_s13 = scalar_lea.hbm %s833_s5, 16 }
 0x20a   :  { %p636_p5 = scmp.ne.s32.totalorder %s833_s5, %s635_s13  ;;  %p639_p6 = scmp.lt.u32.totalorder %s635_s13, %s833_s5 }
 0x20c   :  { %p641_p7 = pnand %p639_p6, %p636_p5 }
 0x20e   :  { %644 = shalt.err (!%p641_p7)
}
 0x20f   :  { %402 = dma.vmem_to_hbm [thread:$0]  %s400_s9, 16, %s833_s5, [#allocation4]  }
 0x210   :  { %645 = dma.done.wait [#allocation4], 16  }
 0x211   :  { %646 = vsyncadd [#allocation4], 4294967280 }
 0x212   :  { %406 = vsyncpa [#allocation4], 1 }

</bundles_post_ra>
